<compile_context>
chip_gen: v7x
topology: tpu7x:2x2x1
jax: 0.10.0
libtpu: 0.0.40
codegen_flags: <defaults>
</compile_context>

<pallas_src>
import jax
import jax.numpy as jnp
from jax.experimental import pallas as pl
from jax.experimental.pallas import tpu as pltpu


# ------------------------------ helpers --------------------------------------
def _round_up(x, m):
    return ((x + m - 1) // m) * m


def _largest_div_tile(total, pref):
    """Largest multiple of 128 that divides `total` (a multiple of 128), <= pref."""
    t = max(128, (min(pref, total) // 128) * 128)
    while total % t != 0:
        t -= 128
    return t


def _device_config():
    """Generation-aware tile prefs / VMEM limit / TensorCore-split preference."""
    try:
        kind = jax.devices()[0].device_kind.lower()
    except Exception:
        kind = ""
    if "v6" in kind:
        # 128 MiB physical VMEM; tile size (not the limit) is the real lever.
        return dict(tm_pref=1024, tk_pref=2048, vmem_limit=100 * 1024 * 1024,
                    split_rows=False)
    if "v5" in kind:
        # 128 MiB physical VMEM, 16 MiB default scoped limit -> raise explicitly.
        return dict(tm_pref=1024, tk_pref=2048, vmem_limit=64 * 1024 * 1024,
                    split_rows=False)
    # v7x (64 MiB physical VMEM, 2 TensorCores) or unknown: headroom + row split.
    return dict(tm_pref=512, tk_pref=2048, vmem_limit=48 * 1024 * 1024,
                split_rows=True)


def _choose_tiling(n, cfg):
    """Pick (n_padded, tm, tk) with tm | n_p, tk | n_p, bounded padding waste."""
    n_p128 = _round_up(max(n, 1), 128)
    tm = min(cfg["tm_pref"], n_p128)
    # Keep zero-padding waste from the row tile under ~12.5% (never fall to 128
    # just because N isn't divisible by the preferred tile).
    while tm > 128 and (_round_up(n_p128, tm) - n_p128) * 8 > n_p128:
        tm -= 128
    n_p = _round_up(n_p128, tm)
    tk = _largest_div_tile(n_p, cfg["tk_pref"])
    # v7x: the "parallel" row axis shards across the two TensorCores; make sure
    # there are at least 2 row tiles (prefer a smaller tm over a single tile).
    if cfg["split_rows"] and n_p // tm < 2 and n_p >= 256:
        tm = _largest_div_tile(n_p, n_p // 2)
    return n_p, tm, tk


def _vmem_bytes(n_p, f_out_p, tm, tk, resident_y):
    """Rough double-buffered working-set estimate for the aggregation kernel."""
    a_buf = 2 * tm * tk                                   # int8 A tiles
    y_buf = 2 * (n_p if resident_y else tk) * f_out_p * 2  # bf16 Y
    d_buf = 2 * tm * 4                                    # dinv_sqrt rows
    b_buf = 2 * f_out_p * 4                               # bias
    o_buf = 2 * tm * f_out_p * 4                          # f32 output tiles
    acc = tm * f_out_p * 4                                # f32 accumulator
    return a_buf + y_buf + d_buf + b_buf + o_buf + acc


# ----------------------------- Pallas kernel ----------------------------------
def _make_gcn_kernel(resident_y, tk):
    def kernel(a_ref, y_ref, d_ref, b_ref, o_ref, acc_ref):
        k = pl.program_id(1)

        @pl.when(k == 0)
        def _():
            acc_ref[...] = jnp.zeros_like(acc_ref)

        # int8 (exact small integer multiplicities) -> bf16 for the MXU.
        # TODO(synk): on v7x this operand could be float8_e4m3 fed to the MXU
        # directly (0/1/small ints are exact), skipping the cast entirely.
        a_tile = a_ref[...].astype(jnp.bfloat16)
        if resident_y:
            start = pl.multiple_of(k * tk, tk)
            y_tile = y_ref[pl.ds(start, tk), :]   # Y resident in VMEM, DMA'd once
        else:
            y_tile = y_ref[...]
        acc_ref[...] += jnp.dot(a_tile, y_tile, preferred_element_type=jnp.float32)

        @pl.when(k == pl.num_programs(1) - 1)
        def _():
            # Fold the row-side D^{-1/2} normalization and bias into the epilogue.
            o_ref[...] = (d_ref[...] * acc_ref[...] + b_ref[...]).astype(o_ref.dtype)

    return kernel


def gcn_aggregate_pallas(a_i8, y_bf16, dinv_col, bias_row, tm, tk, vmem_limit,
                         resident_y):
    """Computes  diag(dinv) @ (A_int8 @ Y) + bias  with a tiled Pallas kernel."""
    n_p = a_i8.shape[0]
    f_out_p = y_bf16.shape[1]
    n_row_tiles = n_p // tm
    n_k_tiles = n_p // tk

    if resident_y:
        y_spec = pl.BlockSpec((n_p, f_out_p), lambda i, k: (0, 0))
        y_bytes = 2 * n_p * f_out_p
    else:
        y_spec = pl.BlockSpec((tk, f_out_p), lambda i, k: (k, 0))
        y_bytes = 2 * n_p * f_out_p * n_row_tiles

    return pl.pallas_call(
        _make_gcn_kernel(resident_y, tk),
        out_shape=jax.ShapeDtypeStruct((n_p, f_out_p), jnp.float32),
        grid_spec=pltpu.PrefetchScalarGridSpec(
            num_scalar_prefetch=0,
            grid=(n_row_tiles, n_k_tiles),                       # reduction last
            in_specs=[
                pl.BlockSpec((tm, tk), lambda i, k: (i, k)),      # A (int8)
                y_spec,                                           # Y (bf16)
                pl.BlockSpec((tm, 1), lambda i, k: (i, 0)),       # dinv_sqrt rows
                pl.BlockSpec((1, f_out_p), lambda i, k: (0, 0)),  # bias
            ],
            out_specs=pl.BlockSpec((tm, f_out_p), lambda i, k: (i, 0)),
            scratch_shapes=[pltpu.VMEM((tm, f_out_p), jnp.float32)],
        ),
        compiler_params=pltpu.CompilerParams(
            dimension_semantics=("parallel", "arbitrary"),
            vmem_limit_bytes=vmem_limit,
        ),
        cost_estimate=pl.CostEstimate(
            flops=2 * n_p * n_p * f_out_p,
            transcendentals=0,
            bytes_accessed=n_p * n_p + y_bytes + 4 * n_p * f_out_p,
        ),
    )(a_i8, y_bf16, dinv_col, bias_row)


# ------------------------------ JAX glue / forward -----------------------------
def na_aggregator_forward(params, x, edge_index):
    """Forward of NaAggregator(in_dim, out_dim, 'GCNConv') — PyG GCNConv defaults."""
    n, _ = x.shape
    w, b = params["weight"], params["bias"]
    f_out = w.shape[1]

    cfg = _device_config()
    n_p, tm, tk = _choose_tiling(n, cfg)
    f_out_p = _round_up(f_out, 128)

    src, dst = edge_index[0], edge_index[1]
    nodes = jnp.arange(n, dtype=src.dtype)
    # add_remaining_self_loops semantics: drop existing self-loop edges, then add
    # a weight-1 self loop for every node (diagonal exactly 1, never 2).
    w_edges = (src != dst).astype(jnp.int8)
    src_all = jnp.concatenate([src, nodes])
    dst_all = jnp.concatenate([dst, nodes])
    w_all = jnp.concatenate([w_edges, jnp.ones((n,), jnp.int8)])

    # Unnormalized adjacency built once, at padded size, in its 1-byte dtype.
    # Layout A[dst, src]: messages flow src -> dst (PyG source_to_target).
    a_i8 = jnp.zeros((n_p, n_p), jnp.int8).at[dst_all, src_all].add(w_all)

    # Degrees from the edge list (O(E + N), no N^2 reduction); keep norm in f32.
    deg = jnp.zeros((n_p,), jnp.float32).at[dst_all].add(w_all.astype(jnp.float32))
    dinv_sqrt = jnp.where(deg > 0.0, jax.lax.rsqrt(deg), 0.0)

    # "Stage 1" folded into glue: Y = D^{-1/2} (X W) — tiny f32 GEMM + row scale,
    # cast to bf16 only for the MXU operand.
    xw = jnp.dot(x, w)
    y = dinv_sqrt[:n, None] * xw
    y_p = jnp.zeros((n_p, f_out_p), jnp.bfloat16).at[:n, :f_out].set(
        y.astype(jnp.bfloat16))

    d_col = dinv_sqrt.reshape(n_p, 1)
    b_p = jnp.zeros((1, f_out_p), jnp.float32).at[:, :f_out].set(
        jnp.asarray(b, jnp.float32).reshape(1, f_out))

    resident_y = _vmem_bytes(n_p, f_out_p, tm, tk, True) <= int(0.75 * cfg["vmem_limit"])
    out_p = gcn_aggregate_pallas(a_i8, y_p, d_col, b_p, tm, tk,
                                 cfg["vmem_limit"], resident_y)
    return out_p[:n, :f_out]


# ------------------------------ references ------------------------------------
def _dense_normalized_adjacency_f32(edge_index, n):
    src, dst = edge_index[0], edge_index[1]
    nodes = jnp.arange(n, dtype=src.dtype)
    w_edges = (src != dst).astype(jnp.float32)
    a = jnp.zeros((n, n), jnp.float32).at[
        jnp.concatenate([dst, nodes]), jnp.concatenate([src, nodes])
    ].add(jnp.concatenate([w_edges, jnp.ones((n,), jnp.float32)]))
    deg = a.sum(axis=1)
    dinv = jnp.where(deg > 0, 1.0 / jnp.sqrt(deg), 0.0)
    return a, dinv


def na_aggregator_reference(params, x, edge_index):
    a, dinv = _dense_normalized_adjacency_f32(edge_index, x.shape[0])
    a_hat = dinv[:, None] * a * dinv[None, :]
    return a_hat @ (x @ params["weight"]) + params["bias"][None, :]


def na_aggregator_reference_bf16(params, x, edge_index):
    # Mirrors the kernel numerics: f32 XW + normalization, bf16 dot operands,
    # f32 accumulation, f32 row-scale + bias epilogue.
    a, dinv = _dense_normalized_adjacency_f32(edge_index, x.shape[0])
    y = (dinv[:, None] * (x @ params["weight"])).astype(jnp.bfloat16)
    acc = jnp.dot(a.astype(jnp.bfloat16), y, preferred_element_type=jnp.float32)
    return dinv[:, None] * acc + params["bias"][None, :]


def glorot(key, shape):
    fan_in, fan_out = shape
    limit = jnp.sqrt(6.0 / (fan_in + fan_out))
    return jax.random.uniform(key, shape, jnp.float32, -limit, limit)


if __name__ == "__main__":
    key = jax.random.PRNGKey(0)
    k_x, k_e, k_w = jax.random.split(key, 3)

    # Small graph consistent with the module forward: x [N, in_dim], edge_index [2, E].
    N, IN_DIM, OUT_DIM, E = 16, 32, 32, 48

    x = jax.random.normal(k_x, (N, IN_DIM), jnp.float32)
    edge_index = jax.random.randint(k_e, (2, E), 0, N, jnp.int32)

    # reset_parameters(): glorot weight, zero bias (GCNConv defaults).
    params = {
        "weight": glorot(k_w, (IN_DIM, OUT_DIM)),
        "bias": jnp.zeros((OUT_DIM,), jnp.float32),
    }

    fwd = jax.jit(na_aggregator_forward)
    out = jax.block_until_ready(fwd(params, x, edge_index))

    ref_bf16 = na_aggregator_reference_bf16(params, x, edge_index)
    ref_f32 = na_aggregator_reference(params, x, edge_index)

    assert out.shape == (N, OUT_DIM)
    # Tight check vs a reference with identical operand dtypes/accumulation.
    assert jnp.allclose(out, ref_bf16, atol=3e-3, rtol=3e-3)
    # Loose check vs full-f32 module semantics (only bf16 rounding of Y remains).
    assert jnp.allclose(out, ref_f32, atol=3e-2, rtol=3e-2)

    print("KERNEL_OK")
</pallas_src>

<mosaic_0001>
module attributes {stable_mosaic.version = 11 : i64} {
  func.func private @main(%arg0: i32) attributes {dimension_semantics = [#tpu.dimension_semantics<core_parallel>], iteration_bounds = array<i64: 2>, tpu.core_type = #tpu.core_type<sc_scalar_subcore>, window_params = []} {
    return
  }
}

module attributes {stable_mosaic.version = 11 : i64} {
  func.func private @main(%arg0: i32) attributes {dimension_semantics = [#tpu.dimension_semantics<core_parallel>], iteration_bounds = array<i64: 2>, tpu.core_type = #tpu.core_type<sc_scalar_subcore>, window_params = []} {
    return
  }
}

module attributes {stable_mosaic.version = 11 : i64} {
  func.func @kernel(%arg0: i32, %arg1: i32, %arg2: memref<128x128xi8, #tpu.memory_space<vmem>>, %arg3: memref<128x128xbf16, #tpu.memory_space<vmem>>, %arg4: memref<128x1xf32, #tpu.memory_space<vmem>>, %arg5: memref<1x128xf32, #tpu.memory_space<vmem>>, %arg6: memref<128x128xf32, #tpu.memory_space<vmem>>, %arg7: memref<128x128xf32, #tpu.memory_space<vmem>>) attributes {dimension_semantics = [#tpu.dimension_semantics<parallel>, #tpu.dimension_semantics<arbitrary>], iteration_bounds = array<i64: 1, 1>, scalar_prefetch = 0 : i64, scratch_operands = 1 : i64, tpu.core_type = #tpu.core_type<tc>, window_params = [{transform_indices = @transform_0, window_bounds = array<i64: 128, 128>}, {pipeline_mode = #tpu.pipeline_mode<synchronous>, transform_indices = @transform_1, window_bounds = array<i64: 128, 128>}, {transform_indices = @transform_2, window_bounds = array<i64: 128, 1>}, {pipeline_mode = #tpu.pipeline_mode<synchronous>, transform_indices = @transform_3, window_bounds = array<i64: 1, 128>}, {transform_indices = @transform_4, window_bounds = array<i64: 128, 128>}]} {
    %c0_i32 = arith.constant 0 : i32
    %0 = arith.cmpi eq, %arg1, %c0_i32 : i32
    %1 = arith.extui %0 : i1 to i32
    %c0_i32_0 = arith.constant 0 : i32
    %2 = arith.cmpi ne, %1, %c0_i32_0 : i32
    scf.if %2 {
      %cst_9 = arith.constant 0.000000e+00 : f32
      %16 = vector.broadcast %cst_9 : f32 to vector<128x128xf32>
      %c0_10 = arith.constant 0 : index
      %c0_11 = arith.constant 0 : index
      %17 = vector.load %arg7[%c0_10, %c0_11] : memref<128x128xf32, #tpu.memory_space<vmem>>, vector<128x128xf32>
      tpu.vector_store %arg7[%c0_10, %c0_11], %16 {strides = array<i32>} : memref<128x128xf32, #tpu.memory_space<vmem>>, vector<128x128xf32>,
    } else {
    }
    %c0 = arith.constant 0 : index
    %c0_1 = arith.constant 0 : index
    %3 = vector.load %arg2[%c0, %c0_1] : memref<128x128xi8, #tpu.memory_space<vmem>>, vector<128x128xi8>
    %4 = arith.sitofp %3 : vector<128x128xi8> to vector<128x128xbf16>
    %c128_i32 = arith.constant 128 : i32
    %5 = arith.muli %arg1, %c128_i32 : i32
    %6 = tpu.assume_multiple %5, 128 : i32
    %7 = arith.index_cast %6 : i32 to index
    %c0_2 = arith.constant 0 : index
    %8 = vector.load %arg3[%7, %c0_2] : memref<128x128xbf16, #tpu.memory_space<vmem>>, vector<128x128xbf16>
    %c0_3 = arith.constant 0 : index
    %c0_4 = arith.constant 0 : index
    %9 = vector.load %arg7[%c0_3, %c0_4] : memref<128x128xf32, #tpu.memory_space<vmem>>, vector<128x128xf32>
    %cst = arith.constant dense<0.000000e+00> : vector<128x128xf32>
    %10 = tpu.matmul %4, %8, %cst {dimension_numbers = #tpu.dot_dimension_numbers<[1], [0], [0], [1], [0, 0, 1, 1], [], []>} : vector<128x128xbf16>, vector<128x128xbf16>, vector<128x128xf32> -> vector<128x128xf32>
    %11 = arith.addf %9, %10 : vector<128x128xf32>
    %c0_5 = arith.constant 0 : index
    %c0_6 = arith.constant 0 : index
    %12 = vector.load %arg7[%c0_5, %c0_6] : memref<128x128xf32, #tpu.memory_space<vmem>>, vector<128x128xf32>
    tpu.vector_store %arg7[%c0_5, %c0_6], %11 {strides = array<i32>} : memref<128x128xf32, #tpu.memory_space<vmem>>, vector<128x128xf32>,
    %c0_i32_7 = arith.constant 0 : i32
    %13 = arith.cmpi eq, %arg1, %c0_i32_7 : i32
    %14 = arith.extui %13 : i1 to i32
    %c0_i32_8 = arith.constant 0 : i32
    %15 = arith.cmpi ne, %14, %c0_i32_8 : i32
    scf.if %15 {
      %c0_9 = arith.constant 0 : index
      %c0_10 = arith.constant 0 : index
      %16 = vector.load %arg4[%c0_9, %c0_10] : memref<128x1xf32, #tpu.memory_space<vmem>>, vector<128x1xf32>
      %c0_11 = arith.constant 0 : index
      %c0_12 = arith.constant 0 : index
      %17 = vector.load %arg7[%c0_11, %c0_12] : memref<128x128xf32, #tpu.memory_space<vmem>>, vector<128x128xf32>
      %18 = vector.broadcast %16 : vector<128x1xf32> to vector<128x128xf32>
      %19 = arith.mulf %18, %17 : vector<128x128xf32>
      %c0_13 = arith.constant 0 : index
      %c0_14 = arith.constant 0 : index
      %20 = vector.load %arg5[%c0_13, %c0_14] : memref<1x128xf32, #tpu.memory_space<vmem>>, vector<1x128xf32>
      %21 = vector.broadcast %20 : vector<1x128xf32> to vector<128x128xf32>
      %22 = arith.addf %19, %21 : vector<128x128xf32>
      %c0_15 = arith.constant 0 : index
      %c0_16 = arith.constant 0 : index
      %23 = vector.load %arg6[%c0_15, %c0_16] : memref<128x128xf32, #tpu.memory_space<vmem>>, vector<128x128xf32>
      tpu.vector_store %arg6[%c0_15, %c0_16], %22 {strides = array<i32>} : memref<128x128xf32, #tpu.memory_space<vmem>>, vector<128x128xf32>,
    } else {
    }
    return
  }
  func.func @transform_0(%arg0: i32, %arg1: i32) -> (i32, i32) {
    %c0_i32 = arith.constant 0 : i32
    return %arg0, %arg1 : i32, i32
  }
  func.func @transform_1(%arg0: i32, %arg1: i32) -> (i32, i32) {
    %c0_i32 = arith.constant 0 : i32
    %c0_i32_0 = arith.constant 0 : i32
    %c0_i32_1 = arith.constant 0 : i32
    return %c0_i32, %c0_i32_0 : i32, i32
  }
  func.func @transform_2(%arg0: i32, %arg1: i32) -> (i32, i32) {
    %c0_i32 = arith.constant 0 : i32
    %c0_i32_0 = arith.constant 0 : i32
    return %arg0, %c0_i32 : i32, i32
  }
  func.func @transform_3(%arg0: i32, %arg1: i32) -> (i32, i32) {
    %c0_i32 = arith.constant 0 : i32
    %c0_i32_0 = arith.constant 0 : i32
    %c0_i32_1 = arith.constant 0 : i32
    return %c0_i32, %c0_i32_0 : i32, i32
  }
  func.func @transform_4(%arg0: i32, %arg1: i32) -> (i32, i32) {
    %c0_i32 = arith.constant 0 : i32
    %c0_i32_0 = arith.constant 0 : i32
    return %arg0, %c0_i32 : i32, i32
  }
}

</mosaic_0001>

<bundles_post_ra>
// kernel: na_aggregator_forward.1
= control target key start
LH: loop header
LB: loop body
LE: loop exit
PB: predicated region body
PF: predicated region fallthrough
CT: control target
= control target key end

     0   :  { %v600_v1 = vmov 0   ;;  %s800_s1 = inlined_call_operand.vmem [shape: bf16[128,128], index: 1, kind: input, shape index: {}]   ;;  %s801_s0 = inlined_call_operand.vmem [shape: s8[128,128], index: 0, kind: input, shape index: {}]   ;;  %s802_s2 = inlined_call_operand.vmem [shape: f32[128,1], index: 2, kind: input, shape index: {}]   ;;  %s803_s3 = inlined_call_operand.vmem [shape: f32[1,128], index: 3, kind: input, shape index: {}]   ;;  %s804_s4 = inlined_call_operand.vmem [shape: f32[128,128], index: 4, kind: output, shape index: {}]  }
   0x1   :  { %v592_v0 = vld [vmem:[%s800_s1] sm:$0xff]   ;;  %591 = vset.pattern.permute.xlu1 %v600_v1  ;;  %590 = vset.pattern.permute.xlu0 %v600_v1  ;;  %v593_v2 = vld [vmem:[%s800_s1 + $0x8] sm:$0xff]   ;;  %v594_v3 = vld [vmem:[%s800_s1 + $0x10] sm:$0xff]  }
   0x2   :  { %541 = vmatprep.subr.bf16.mxu0 %v592_v0  ;;  %573 = vmatprep.subr.bf16.mxu1 %v592_v0  ;;  %v595_v4 = vld [vmem:[%s800_s1 + $0x18] sm:$0xff]   ;;  %v38_v5 = vld [vmem:[%s801_s0] sm:$0x3]  ;;  %v39_v6 = vld [vmem:[%s801_s0 + $0x2] sm:$0x3] }
   0x3   :  { %542 = vmatpush3.bf16.msra.mxu0 %v592_v0  ;;  %581 = vmatpush3.bf16.msra.mxu1 %v592_v0  ;;  %v46_v7 = vld [vmem:[%s801_s0 + $0x10] sm:$0x3]  ;;  %v54_v8 = vunpack.c.l.s8.bf16 %v38_v5  ;;  %v55_v9 = vunpack.c.l.s8.bf16 %v39_v6  ;;  %v47_v10 = vld [vmem:[%s801_s0 + $0x12] sm:$0x3]  ;;  %v596_v14 = vld [vmem:[%s800_s1 + $0x20] sm:$0xff]  }
   0x4   :  { %543 = vmatprep.subr.bf16.mxu0 %v593_v2  ;;  %574 = vmatprep.subr.bf16.mxu1 %v593_v2  ;;  %v62_v11 = vunpack.c.l.s8.bf16 %v46_v7  ;;  %v63_v12 = vunpack.c.l.s8.bf16 %v47_v10  ;;  %v337_v16 = vld [vmem:[%s802_s2 + $0x10] sm:$0xff]  ;;  %v335_v17 = vld [vmem:[%s802_s2] sm:$0xff]  ;;  %v338_v18 = vld [vmem:[%s802_s2 + $0x18] sm:$0xff] }
   0x5   :  { %v508_v13 = vcombine.low %v54_v8, %v55_v9  ;;  %379 = vperm.xlu1 %591, %v337_v16   ;;  %v597_v19 = vld [vmem:[%s800_s1 + $0x28] sm:$0xff]   ;;  %369 = vperm.xlu0 %590, %v335_v17   ;;  %v598_v22 = vld [vmem:[%s800_s1 + $0x30] sm:$0xff]   ;;  %v40_v23 = vld [vmem:[%s801_s0 + $0x4] sm:$0x3] }
   0x6   :  { %v512_v15 = vcombine.low %v62_v11, %v63_v12  ;;  %v336_v20 = vld [vmem:[%s802_s2 + $0x8] sm:$0xff]  ;;  %v599_v24 = vld [vmem:[%s800_s1 + $0x38] sm:$0xff]   ;;  %v41_v25 = vld [vmem:[%s801_s0 + $0x6] sm:$0x3]  ;;  %v56_v34 = vunpack.c.l.s8.bf16 %v40_v23 }
   0x7   :  { %544 = vmatpush3.bf16.msra.mxu0 %v593_v2  ;;  %582 = vmatpush3.bf16.msra.mxu1 %v593_v2  ;;  %v340_v21 = vld [vmem:[%s802_s2 + $0x28] sm:$0xff]  ;;  %v48_v26 = vld [vmem:[%s801_s0 + $0x14] sm:$0x3]  ;;  %v339_v27 = vld [vmem:[%s802_s2 + $0x20] sm:$0xff]  ;;  %v57_v35 = vunpack.c.l.s8.bf16 %v41_v25 }
   0x8   :  { %545 = vmatprep.subr.bf16.mxu0 %v594_v3  ;;  %575 = vmatprep.subr.bf16.mxu1 %v594_v3  ;;  %v49_v28 = vld [vmem:[%s801_s0 + $0x16] sm:$0x3]  ;;  %v42_v29 = vld [vmem:[%s801_s0 + $0x8] sm:$0x3]  ;;  %v342_v30 = vld [vmem:[%s802_s2 + $0x38] sm:$0xff]  ;;  %v64_v36 = vunpack.c.l.s8.bf16 %v48_v26 }
   0x9   :  { %557 = vmatprep.mubr.bf16.mxu0 %v508_v13  ;;  %565 = vmatprep.mubr.bf16.mxu1 %v512_v15  ;;  %v43_v31 = vld [vmem:[%s801_s0 + $0xa] sm:$0x3]  ;;  %v50_v32 = vld [vmem:[%s801_s0 + $0x18] sm:$0x3]  ;;  %v51_v33 = vld [vmem:[%s801_s0 + $0x1a] sm:$0x3]  ;;  %v65_v37 = vunpack.c.l.s8.bf16 %v49_v28  ;;  %v58_v39 = vunpack.c.l.s8.bf16 %v42_v29  ;;  %v509_v44 = vcombine.low %v56_v34, %v57_v35 }
   0xa   :  { %384 = vperm.xlu1 %591, %v338_v18   ;;  %374 = vperm.xlu0 %590, %v336_v20   ;;  %v341_v38 = vld [vmem:[%s802_s2 + $0x30] sm:$0xff]  ;;  %v59_v40 = vunpack.c.l.s8.bf16 %v43_v31  ;;  %v66_v41 = vunpack.c.l.s8.bf16 %v50_v32  ;;  %v67_v42 = vunpack.c.l.s8.bf16 %v51_v33  ;;  %v344_v43 = vld [vmem:[%s802_s2 + $0x48] sm:$0xff]  ;;  %v343_v47 = vld [vmem:[%s802_s2 + $0x40] sm:$0xff] }
   0xb   :  { %546 = vmatpush3.bf16.msra.mxu0 %v594_v3  ;;  %583 = vmatpush3.bf16.msra.mxu1 %v594_v3  ;;  %v513_v45 = vcombine.low %v64_v36, %v65_v37  ;;  %v44_v46 = vld [vmem:[%s801_s0 + $0xc] sm:$0x3]  ;;  %v45_v50 = vld [vmem:[%s801_s0 + $0xe] sm:$0x3]  ;;  %v52_v51 = vld [vmem:[%s801_s0 + $0x1c] sm:$0x3] }
   0xc   :  { %547 = vmatprep.subr.bf16.mxu0 %v595_v4  ;;  %576 = vmatprep.subr.bf16.mxu1 %v595_v4  ;;  %v510_v48 = vcombine.low %v58_v39, %v59_v40  ;;  %v514_v49 = vcombine.low %v66_v41, %v67_v42  ;;  %v53_v52 = vld [vmem:[%s801_s0 + $0x1e] sm:$0x3]  ;;  %v60_v54 = vunpack.c.l.s8.bf16 %v44_v46  ;;  %v61_v55 = vunpack.c.l.s8.bf16 %v45_v50  ;;  %v345_v58 = vld [vmem:[%s802_s2 + $0x50] sm:$0xff]  ;;  %v348_v59 = vld [vmem:[%s802_s2 + $0x68] sm:$0xff] }
   0xd   :  { %v346_v53 = vld [vmem:[%s802_s2 + $0x58] sm:$0xff]  ;;  %v68_v56 = vunpack.c.l.s8.bf16 %v52_v51  ;;  %v69_v57 = vunpack.c.l.s8.bf16 %v53_v52  ;;  %v347_v62 = vld [vmem:[%s802_s2 + $0x60] sm:$0xff]  ;;  %v349_v0 = vld [vmem:[%s802_s2 + $0x70] sm:$0xff] }
   0xe   :  { %394 = vperm.xlu1 %591, %v340_v21   ;;  %389 = vperm.xlu0 %590, %v339_v27   ;;  %v511_v60 = vcombine.low %v60_v54, %v61_v55  ;;  %v350_v63 = vld [vmem:[%s802_s2 + $0x78] sm:$0xff]  ;;  %v524_v16 = vld [vmem:[%s803_s3] ss:$0 sm:$0xff] }
   0xf   :  { %548 = vmatpush3.bf16.msra.mxu0 %v595_v4  ;;  %584 = vmatpush3.bf16.msra.mxu1 %v595_v4  ;;  %v515_v61 = vcombine.low %v68_v56, %v69_v57 }
  0x10   :  { %549 = vmatprep.subr.bf16.mxu0 %v596_v14  ;;  %577 = vmatprep.subr.bf16.mxu1 %v596_v14 }
  0x12   :  { %404 = vperm.xlu1 %591, %v342_v30   ;;  %399 = vperm.xlu0 %590, %v341_v38  }
  0x13   :  { %550 = vmatpush3.bf16.msra.mxu0 %v596_v14  ;;  %585 = vmatpush3.bf16.msra.mxu1 %v596_v14 }
  0x14   :  { %551 = vmatprep.subr.bf16.mxu0 %v597_v19  ;;  %578 = vmatprep.subr.bf16.mxu1 %v597_v19 }
  0x16   :  { %414 = vperm.xlu1 %591, %v344_v43   ;;  %409 = vperm.xlu0 %590, %v343_v47  }
  0x17   :  { %552 = vmatpush3.bf16.msra.mxu0 %v597_v19  ;;  %586 = vmatpush3.bf16.msra.mxu1 %v597_v19 }
  0x18   :  { %553 = vmatprep.subr.bf16.mxu0 %v598_v22  ;;  %579 = vmatprep.subr.bf16.mxu1 %v598_v22 }
  0x1a   :  { %424 = vperm.xlu1 %591, %v346_v53   ;;  %419 = vperm.xlu0 %590, %v345_v58  }
  0x1b   :  { %554 = vmatpush3.bf16.msra.mxu0 %v598_v22  ;;  %587 = vmatpush3.bf16.msra.mxu1 %v598_v22 }
  0x1c   :  { %555 = vmatprep.subr.bf16.mxu0 %v599_v24  ;;  %580 = vmatprep.subr.bf16.mxu1 %v599_v24 }
  0x1e   :  { %434 = vperm.xlu1 %591, %v348_v59   ;;  %429 = vperm.xlu0 %590, %v347_v62  }
  0x1f   :  { %556 = vmatpush3.bf16.msra.mxu0 %v599_v24  ;;  %588 = vmatpush3.bf16.msra.mxu1 %v599_v24 }
  0x22   :  { %558 = vmatmul.mubr.bf16.vlgmr.msra.gmra.mrb[0].mxu0 %v509_v44  ;;  %566 = vmatmul.mubr.bf16.vlgmr.msra.gmra.mrb[0].mxu1 %v513_v45 }
  0x23   :  { %561 = vmatprep.mubr.bf16.mxu0 %v510_v48  ;;  %569 = vmatprep.mubr.bf16.mxu1 %v514_v49 }
  0x24   :  { %444 = vperm.xlu1 %591, %v350_v63   ;;  %439 = vperm.xlu0 %590, %v349_v0  }
  0x2a   :  { %562 = vmatmul.mubr.bf16.gmra.mrb[4].mxu0 %v511_v60  ;;  %570 = vmatmul.mubr.bf16.gmra.mrb[4].mxu1 %v515_v61 }
  0x84   :  { %v380_v1 = vpop.permute.xlu1 %379  ;;  %v370_v2 = vpop.permute.xlu0 %369 }
  0x89   :  { %v385_v3 = vpop.permute.xlu1 %384  ;;  %v375_v4 = vpop.permute.xlu0 %374 }
  0x8d   :  { %v746_v5 = vpop.permute.xlu1 %394  ;;  %v390_v6 = vpop.permute.xlu0 %389 }
  0x91   :  { %v405_v7 = vpop.permute.xlu1 %404  ;;  %v400_v8 = vpop.permute.xlu0 %399 }
  0x95   :  { %v415_v9 = vpop.permute.xlu1 %414  ;;  %v410_v10 = vpop.permute.xlu0 %409 }
  0x99   :  { %v425_v11 = vpop.permute.xlu1 %424  ;;  %v420_v12 = vpop.permute.xlu0 %419 }
  0x9d   :  { %v435_v13 = vpop.permute.xlu1 %434  ;;  %v430_v14 = vpop.permute.xlu0 %429 }
  0xa3   :  { %v445_v40 = vpop.permute.xlu1 %444  ;;  %v440_v41 = vpop.permute.xlu0 %439 }
  0xf5   :  { %v559_v15 = vpop.f32.mrb[0].mxu0  ;;  %v567_v17 = vpop.f32.mrb[0].mxu1 }
  0xf6   :  { %v449_v18 = vmul.f32 %v559_v15, %v380_v1  ;;  %v457_v19 = vmul.f32 %v567_v17, %v420_v12  ;;  %v237_v20 = vpop.f32.mrb[1].mxu0  ;;  %v269_v21 = vpop.f32.mrb[1].mxu1 }
  0xf7   :  { %v447_v22 = vmul.f32 %v370_v2, %v237_v20  ;;  %v455_v23 = vmul.f32 %v410_v10, %v269_v21  ;;  %v560_v24 = vpop.f32.mrb[2].mxu0  ;;  %v568_v25 = vpop.f32.mrb[2].mxu1 }
  0xf8   :  { %v472_v26 = vadd.f32 %v524_v16, %v449_v18  ;;  %v480_v27 = vadd.f32 %v524_v16, %v457_v19  ;;  %v450_v28 = vmul.f32 %v560_v24, %v385_v3  ;;  %v458_v29 = vmul.f32 %v568_v25, %v425_v11  ;;  %v240_v30 = vpop.f32.mrb[3].mxu0  ;;  %v272_v31 = vpop.f32.mrb[3].mxu1 }
  0xf9   :  { %v470_v32 = vadd.f32 %v524_v16, %v447_v22  ;;  %v478_v33 = vadd.f32 %v524_v16, %v455_v23  ;;  %v448_v34 = vmul.f32 %v375_v4, %v240_v30  ;;  %v456_v35 = vmul.f32 %v415_v9, %v272_v31 }
  0xfa   :  { %488 = vst [vmem:[%s804_s4 + $0x10] sm:$0xff] %v472_v26  ;;  %496 = vst [vmem:[%s804_s4 + $0x50] sm:$0xff] %v480_v27  ;;  %v473_v36 = vadd.f32 %v524_v16, %v450_v28  ;;  %v481_v37 = vadd.f32 %v524_v16, %v458_v29 }
  0xfb   :  { %486 = vst [vmem:[%s804_s4] sm:$0xff] %v470_v32  ;;  %494 = vst [vmem:[%s804_s4 + $0x40] sm:$0xff] %v478_v33  ;;  %v471_v38 = vadd.f32 %v524_v16, %v448_v34  ;;  %v479_v39 = vadd.f32 %v524_v16, %v456_v35 }
  0xfc   :  { %489 = vst [vmem:[%s804_s4 + $0x18] sm:$0xff] %v473_v36  ;;  %497 = vst [vmem:[%s804_s4 + $0x58] sm:$0xff] %v481_v37 }
  0xfd   :  { %487 = vst [vmem:[%s804_s4 + $0x8] sm:$0xff] %v471_v38  ;;  %495 = vst [vmem:[%s804_s4 + $0x48] sm:$0xff] %v479_v39  ;;  %v563_v42 = vpop.f32.mrb[4].mxu0  ;;  %v571_v43 = vpop.f32.mrb[4].mxu1 }
  0xfe   :  { %v453_v44 = vmul.f32 %v563_v42, %v400_v8  ;;  %v461_v45 = vmul.f32 %v571_v43, %v440_v41  ;;  %v253_v46 = vpop.f32.mrb[5].mxu0  ;;  %v285_v47 = vpop.f32.mrb[5].mxu1 }
  0xff   :  { %v451_v48 = vmul.f32 %v390_v6, %v253_v46  ;;  %v459_v49 = vmul.f32 %v430_v14, %v285_v47  ;;  %v564_v50 = vpop.f32.mrb[6].mxu0  ;;  %v572_v51 = vpop.f32.mrb[6].mxu1 }
 0x100   :  { %v476_v52 = vadd.f32 %v524_v16, %v453_v44  ;;  %v484_v53 = vadd.f32 %v524_v16, %v461_v45  ;;  %v454_v54 = vmul.f32 %v564_v50, %v405_v7  ;;  %v462_v55 = vmul.f32 %v572_v51, %v445_v40  ;;  %v256_v56 = vpop.f32.mrb[7].mxu0  ;;  %v288_v57 = vpop.f32.mrb[7].mxu1 }
 0x101   :  { %v474_v58 = vadd.f32 %v524_v16, %v451_v48  ;;  %v482_v59 = vadd.f32 %v524_v16, %v459_v49  ;;  %v452_v60 = vmul.f32 %v746_v5, %v256_v56  ;;  %v460_v61 = vmul.f32 %v435_v13, %v288_v57 }
 0x102   :  { %492 = vst [vmem:[%s804_s4 + $0x30] sm:$0xff] %v476_v52  ;;  %500 = vst [vmem:[%s804_s4 + $0x70] sm:$0xff] %v484_v53  ;;  %v477_v62 = vadd.f32 %v524_v16, %v454_v54  ;;  %v485_v63 = vadd.f32 %v524_v16, %v462_v55 }
 0x103   :  { %490 = vst [vmem:[%s804_s4 + $0x20] sm:$0xff] %v474_v58  ;;  %498 = vst [vmem:[%s804_s4 + $0x60] sm:$0xff] %v482_v59  ;;  %v475_v0 = vadd.f32 %v524_v16, %v452_v60  ;;  %v483_v1 = vadd.f32 %v524_v16, %v460_v61 }
 0x104   :  { %493 = vst [vmem:[%s804_s4 + $0x38] sm:$0xff] %v477_v62  ;;  %501 = vst [vmem:[%s804_s4 + $0x78] sm:$0xff] %v485_v63 }
 0x105   :  { %491 = vst [vmem:[%s804_s4 + $0x28] sm:$0xff] %v475_v0  ;;  %499 = vst [vmem:[%s804_s4 + $0x68] sm:$0xff] %v483_v1 }

</bundles_post_ra>
